<compile_context>
chip_gen: v5e
topology: v5e:2x2
jax: 0.10.0
libtpu: 0.0.40
codegen_flags: <defaults>
</compile_context>

<pallas_src>
import jax
import jax.numpy as jnp
from jax.experimental import pallas as pl
from jax.experimental.pallas import tpu as pltpu


def _upsample_matmul_kernel(s_ref, x_ref, o_ref):
    # s_ref : VMEM (cb, C_in)   scatter matrix block (scaled one-hot rows)
    # x_ref : VMEM (C_in, T)    spatial tile of one batch element
    # o_ref : VMEM (cb, T)      corresponding output tile
    o_ref[...] = jnp.dot(
        s_ref[...],
        x_ref[...],
        preferred_element_type=jnp.float32,
        precision=jax.lax.Precision.HIGHEST,
    ).astype(o_ref.dtype)


def _round_up(x, m):
    return ((x + m - 1) // m) * m


def _generation_config():
    """(per-block byte budget, scoped-VMEM limit) tuned per TPU generation."""
    try:
        kind = jax.devices()[0].device_kind.lower()
    except Exception:  # pragma: no cover - defensive
        kind = ""
    if "v7" in kind:
        # 64 MiB physical VMEM, 3.2 TB/s HBM: big tiles pay most, but cap VMEM.
        return 6 << 20, 48 << 20
    if "v6" in kind:
        # 128 MiB physical VMEM (32 MiB scoped default): go large.
        return 8 << 20, 80 << 20
    # v5e / older / unknown: conservative blocks, modest scoped-VMEM raise.
    return 3 << 20, 32 << 20


def _pick_spatial_tile(n, hw, c_rows, block_budget, itemsize):
    """Fixed lane-dense tile: largest multiple of 128 whose biggest block
    (c_rows x t) stays under `block_budget`, capped at the padded spatial
    extent, and shrunk if needed so a parallel grid axis has >= 2 steps."""
    t = max(128, (block_budget // max(1, c_rows * itemsize)) // 128 * 128)
    t = min(t, _round_up(hw, 128))
    # v7x dual TensorCore: make sure some parallel axis has >= 2 iterations.
    if n * pl.cdiv(hw, t) < 2 and hw > 128:
        t = max(128, _round_up(pl.cdiv(hw, 2), 128))
    return t


def upsample_layer(x, mask, scale=None):
    """Pallas implementation of UpsampleLayer.forward.

    x     : (N, C_in, H, W) with C_in == int((mask != 0).sum())
    mask  : (C_out,) 0/1 (any nonzero counts as "keep")
    scale : optional (C_out,)
    returns (N, C_out, H, W)
    """
    n, c_in, h, w = x.shape
    mask = jnp.asarray(mask)
    c_out = int(mask.shape[0])

    # PyTorch allocates a float output buffer; mirror that for non-float inputs
    # (also keeps integers off the matmul path).
    if not jnp.issubdtype(x.dtype, jnp.floating):
        x = x.astype(jnp.float32)
    out_dtype = x.dtype

    # Edge case: every channel masked out -> all-zero output.
    if c_in == 0:
        out = jnp.zeros((n, c_out, h, w), dtype=out_dtype)
        if scale is not None:
            out = out * jnp.asarray(scale, out_dtype)[None, :, None, None]
        return out

    # gather_idx[c] = input channel feeding output channel c (arbitrary where
    # mask == 0; those rows of S are zero anyway).
    mask_i = (mask != 0).astype(jnp.int32)
    gather_idx = jnp.clip(jnp.cumsum(mask_i) - 1, 0, c_in - 1)

    coef = mask_i.astype(jnp.float32)
    if scale is not None:
        coef = coef * jnp.asarray(scale, jnp.float32)

    # One-hot scatter matrix S: (C_out, C_in), S[c, gather_idx[c]] = coef[c].
    onehot = gather_idx[:, None] == jnp.arange(c_in, dtype=jnp.int32)[None, :]
    s_mat = (coef[:, None] * onehot.astype(jnp.float32)).astype(out_dtype)

    hw = h * w
    x2 = x.reshape(n, c_in, hw)
    itemsize = jnp.dtype(out_dtype).itemsize

    # C_out blocking bounds the VMEM footprint of S / out blocks for large C.
    # TODO(synk): for very large pruned C (>~2K), a scalar-prefetched windowed
    # formulation (contiguous C_in window per C_out block) would also cut the
    # O(C_in*C_out) MXU work; the dense per-block S is kept for robustness.
    cb = c_out if c_out <= 256 else 256
    num_cb = pl.cdiv(c_out, cb)

    block_budget, vmem_limit = _generation_config()
    t = _pick_spatial_tile(n, hw, max(c_in, cb), block_budget, itemsize)
    num_t = pl.cdiv(hw, t)
    grid = (n, num_t, num_cb)

    cost = pl.CostEstimate(
        flops=2 * n * c_in * c_out * hw,
        transcendentals=0,
        bytes_accessed=(n * c_in * hw + n * c_out * hw + c_out * c_in) * itemsize,
    )
    cparams = pltpu.CompilerParams(
        dimension_semantics=("parallel", "parallel", "arbitrary"),
        vmem_limit_bytes=vmem_limit,
    )

    def build(single_buffer_s):
        s_kwargs = (
            {"pipeline_mode": pl.Buffered(1)}
            if (single_buffer_s and hasattr(pl, "Buffered"))
            else {}
        )
        return pl.pallas_call(
            _upsample_matmul_kernel,
            out_shape=jax.ShapeDtypeStruct((n, c_out, hw), out_dtype),
            grid=grid,
            in_specs=[
                # S block: constant along batch/spatial axes -> single buffer.
                pl.BlockSpec((cb, c_in), lambda b, s, j: (j, 0), **s_kwargs),
                # x: one batch element, one lane-dense spatial tile (last tile
                # may overhang; only valid lanes are ever stored).
                pl.BlockSpec((None, c_in, t), lambda b, s, j: (b, 0, s)),
            ],
            out_specs=pl.BlockSpec((None, cb, t), lambda b, s, j: (b, j, s)),
            compiler_params=cparams,
            cost_estimate=cost,
        )

    try:
        out = build(single_buffer_s=True)(s_mat, x2)
    except Exception:
        # Fallback for jax versions where pipeline_mode / Buffered(1) is not
        # supported on pallas_call BlockSpecs.
        out = build(single_buffer_s=False)(s_mat, x2)

    return out.reshape(n, c_out, h, w)


def _reference(x, mask, scale=None):
    n, c_in, h, w = x.shape
    c_out = mask.shape[0]
    indices = jnp.nonzero(mask, size=c_in)[0]
    out = jnp.zeros((n, c_out, h, w), dtype=x.dtype)
    out = out.at[:, indices].set(x)
    if scale is not None:
        out = out * jnp.asarray(scale, x.dtype)[None, :, None, None]
    return out


if __name__ == "__main__":
    key = jax.random.PRNGKey(0)
    k1, k2, k3 = jax.random.split(key, 3)

    # Test 1: per-channel scale, H*W multiple of 128, batch-parallel grid.
    mask = jnp.array([1, 0, 1, 1, 0, 0, 1, 0], dtype=jnp.int32)
    c_in = int(mask.sum())
    scale = (jnp.arange(mask.shape[0], dtype=jnp.float32) + 1.0) * 0.5
    n, h, w = 2, 16, 16
    x = jax.random.normal(k1, (n, c_in, h, w), dtype=jnp.float32)
    out = jax.block_until_ready(upsample_layer(x, mask, scale))
    ref = _reference(x, mask, scale)
    assert out.shape == (n, mask.shape[0], h, w)
    assert jnp.allclose(out, ref, atol=1e-5, rtol=1e-5), "mismatch (scaled)"

    # Test 2: no scale, spatial extent (10*10=100) not a multiple of 128 ->
    # single overhanging lane-dense tile with a masked partial store.
    mask2 = jnp.array([0, 1, 1, 0, 1], dtype=jnp.int32)
    c_in2 = int(mask2.sum())
    x2 = jax.random.normal(k2, (1, c_in2, 10, 10), dtype=jnp.float32)
    out2 = jax.block_until_ready(upsample_layer(x2, mask2))
    ref2 = _reference(x2, mask2)
    assert jnp.allclose(out2, ref2, atol=1e-5, rtol=1e-5), "mismatch (unscaled)"

    # Test 3: N=1, 14x14 spatial (196, not 128-divisible) -> tile shrunk so the
    # cdiv grid has >=2 spatial steps, last tile partially masked.
    x3 = jax.random.normal(k3, (1, c_in, 14, 14), dtype=jnp.float32)
    out3 = jax.block_until_ready(upsample_layer(x3, mask, scale))
    ref3 = _reference(x3, mask, scale)
    assert jnp.allclose(out3, ref3, atol=1e-5, rtol=1e-5), "mismatch (14x14)"

    print("KERNEL_OK")
</pallas_src>

<mosaic_0001>
module attributes {stable_mosaic.version = 11 : i64} {
  func.func @_upsample_matmul_kernel(%arg0: i32, %arg1: i32, %arg2: i32, %arg3: memref<8x4xf32, #tpu.memory_space<vmem>>, %arg4: memref<1x4x256xf32, #tpu.memory_space<vmem>>, %arg5: memref<1x8x256xf32, #tpu.memory_space<vmem>>) attributes {dimension_semantics = [#tpu.dimension_semantics<parallel>, #tpu.dimension_semantics<parallel>, #tpu.dimension_semantics<arbitrary>], iteration_bounds = array<i64: 2, 1, 1>, scalar_prefetch = 0 : i64, scratch_operands = 0 : i64, tpu.core_type = #tpu.core_type<tc>, window_params = [{pipeline_mode = #tpu.pipeline_mode<synchronous>, transform_indices = @transform_0, window_bounds = array<i64: 8, 4>}, {transform_indices = @transform_1, window_bounds = array<i64: 1, 4, 256>}, {transform_indices = @transform_2, window_bounds = array<i64: 1, 8, 256>}]} {
    %c0 = arith.constant 0 : index
    %c0_0 = arith.constant 0 : index
    %0 = vector.load %arg3[%c0, %c0_0] : memref<8x4xf32, #tpu.memory_space<vmem>>, vector<8x4xf32>
    %c0_1 = arith.constant 0 : index
    %c0_2 = arith.constant 0 : index
    %c0_3 = arith.constant 0 : index
    %1 = vector.load %arg4[%c0_1, %c0_2, %c0_3] : memref<1x4x256xf32, #tpu.memory_space<vmem>>, vector<1x4x256xf32>
    %2 = vector.shape_cast %1 : vector<1x4x256xf32> to vector<4x256xf32>
    %cst = arith.constant dense<0.000000e+00> : vector<8x256xf32>
    %3 = tpu.matmul %0, %2, %cst {dimension_numbers = #tpu.dot_dimension_numbers<[1], [0], [0], [1], [0, 0, 1, 1], [], []>, precision = #tpu.contract_precision<fp32>} : vector<8x4xf32>, vector<4x256xf32>, vector<8x256xf32> -> vector<8x256xf32>
    %c0_4 = arith.constant 0 : index
    %c0_5 = arith.constant 0 : index
    %c0_6 = arith.constant 0 : index
    %4 = vector.load %arg5[%c0_4, %c0_5, %c0_6] : memref<1x8x256xf32, #tpu.memory_space<vmem>>, vector<1x8x256xf32>
    %5 = vector.shape_cast %4 : vector<1x8x256xf32> to vector<8x256xf32>
    %6 = vector.shape_cast %3 : vector<8x256xf32> to vector<1x8x256xf32>
    tpu.vector_store %arg5[%c0_4, %c0_5, %c0_6], %6 {strides = array<i32>} : memref<1x8x256xf32, #tpu.memory_space<vmem>>, vector<1x8x256xf32>,
    return
  }
  func.func @transform_0(%arg0: i32, %arg1: i32, %arg2: i32) -> (i32, i32) {
    %c0_i32 = arith.constant 0 : i32
    %c0_i32_0 = arith.constant 0 : i32
    return %arg2, %c0_i32 : i32, i32
  }
  func.func @transform_1(%arg0: i32, %arg1: i32, %arg2: i32) -> (i32, i32, i32) {
    %c0_i32 = arith.constant 0 : i32
    %c0_i32_0 = arith.constant 0 : i32
    return %arg0, %c0_i32, %arg1 : i32, i32, i32
  }
  func.func @transform_2(%arg0: i32, %arg1: i32, %arg2: i32) -> (i32, i32, i32) {
    %c0_i32 = arith.constant 0 : i32
    return %arg0, %arg2, %arg1 : i32, i32, i32
  }
}

module attributes {stable_mosaic.version = 11 : i64} {
  func.func @_upsample_matmul_kernel(%arg0: i32, %arg1: i32, %arg2: i32, %arg3: memref<8x4xf32, #tpu.memory_space<vmem>>, %arg4: memref<1x4x256xf32, #tpu.memory_space<vmem>>, %arg5: memref<1x8x256xf32, #tpu.memory_space<vmem>>) attributes {dimension_semantics = [#tpu.dimension_semantics<parallel>, #tpu.dimension_semantics<parallel>, #tpu.dimension_semantics<arbitrary>], iteration_bounds = array<i64: 2, 1, 1>, scalar_prefetch = 0 : i64, scratch_operands = 0 : i64, tpu.core_type = #tpu.core_type<tc>, window_params = [{transform_indices = @transform_0, window_bounds = array<i64: 8, 4>}, {transform_indices = @transform_1, window_bounds = array<i64: 1, 4, 256>}, {transform_indices = @transform_2, window_bounds = array<i64: 1, 8, 256>}]} {
    %c0 = arith.constant 0 : index
    %c0_0 = arith.constant 0 : index
    %0 = vector.load %arg3[%c0, %c0_0] : memref<8x4xf32, #tpu.memory_space<vmem>>, vector<8x4xf32>
    %c0_1 = arith.constant 0 : index
    %c0_2 = arith.constant 0 : index
    %c0_3 = arith.constant 0 : index
    %1 = vector.load %arg4[%c0_1, %c0_2, %c0_3] : memref<1x4x256xf32, #tpu.memory_space<vmem>>, vector<1x4x256xf32>
    %2 = vector.shape_cast %1 : vector<1x4x256xf32> to vector<4x256xf32>
    %cst = arith.constant dense<0.000000e+00> : vector<8x256xf32>
    %3 = tpu.matmul %0, %2, %cst {dimension_numbers = #tpu.dot_dimension_numbers<[1], [0], [0], [1], [0, 0, 1, 1], [], []>, precision = #tpu.contract_precision<fp32>} : vector<8x4xf32>, vector<4x256xf32>, vector<8x256xf32> -> vector<8x256xf32>
    %c0_4 = arith.constant 0 : index
    %c0_5 = arith.constant 0 : index
    %c0_6 = arith.constant 0 : index
    %4 = vector.load %arg5[%c0_4, %c0_5, %c0_6] : memref<1x8x256xf32, #tpu.memory_space<vmem>>, vector<1x8x256xf32>
    %5 = vector.shape_cast %4 : vector<1x8x256xf32> to vector<8x256xf32>
    %6 = vector.shape_cast %3 : vector<8x256xf32> to vector<1x8x256xf32>
    tpu.vector_store %arg5[%c0_4, %c0_5, %c0_6], %6 {strides = array<i32>} : memref<1x8x256xf32, #tpu.memory_space<vmem>>, vector<1x8x256xf32>,
    return
  }
  func.func @transform_0(%arg0: i32, %arg1: i32, %arg2: i32) -> (i32, i32) {
    %c0_i32 = arith.constant 0 : i32
    %c0_i32_0 = arith.constant 0 : i32
    return %arg2, %c0_i32 : i32, i32
  }
  func.func @transform_1(%arg0: i32, %arg1: i32, %arg2: i32) -> (i32, i32, i32) {
    %c0_i32 = arith.constant 0 : i32
    %c0_i32_0 = arith.constant 0 : i32
    return %arg0, %c0_i32, %arg1 : i32, i32, i32
  }
  func.func @transform_2(%arg0: i32, %arg1: i32, %arg2: i32) -> (i32, i32, i32) {
    %c0_i32 = arith.constant 0 : i32
    return %arg0, %arg2, %arg1 : i32, i32, i32
  }
}

</mosaic_0001>

<bundles_post_ra>
// kernel: tpu_custom_call.1
= control target key start
LH: loop header
LB: loop body
LE: loop exit
PB: predicated region body
PF: predicated region fallthrough
CT: control target
= control target key end

     0   :  { %7 = vsyncpa [#allocation3], 0  ;;  %s975_s0 = inlined_call_operand.vmem [shape: f32[8,4], index: 0, kind: input, shape index: {}]   ;;  %s976_s1 = inlined_call_operand.hbm [shape: f32[2,4,256], index: 1, kind: input, shape index: {}]   ;;  %s977_s2 = inlined_call_operand.hbm [shape: f32[2,8,256], index: 2, kind: output, shape index: {}]  }
   0x1   :  { %9 = vsyncpa [#allocation3 + $0x1], 0 }
   0x2   :  { %10 = vsyncpa [#allocation4], 0 }
   0x3   :  { %12 = vsyncpa [#allocation4 + $0x1], 0  ;;  %s851_s9 = smov 0   ;;  %s853_s10 = smov 0  }
   0x4   :  { %s855_s11 = smov 0   ;;  %s857_s12 = smov 0  }
   0x5   :  { %s859_s13 = smov 0   ;;  %s861_s14 = smov 0  }
   0x6 LB: > { %s642_s15 = sadd.s32 4294967295, %s834_s14   ;;  %s643_s16 = sadd.s32 4294967294, %s834_s14   ;;  %s834_s14 = sphi %s861_s14, %s18_s14   ;;  %s830_s13 = sphi %s859_s13, %s986_s13   ;;  %s826_s12 = sphi %s857_s12, %s985_s12   ;;  %s822_s11 = sphi %s855_s11, %s984_s11   ;;  %s818_s10 = sphi %s853_s10, %s983_s10   ;;  %s814_s9 = sphi %s851_s9, %s982_s9  }
   0x7   : > { %s37_s17 = sadd.s32 1, %s830_s13  ;;  %s72_s18 = sadd.s32 1, %s822_s11 }
   0x8   : > { %p39_p0 = scmp.ge.s32.totalorder %s37_s17, 2  ;;  %p79_p1 = scmp.ne.s32.totalorder %s822_s11, %s818_s10 }
   0x9   : > { %p80_p2 = scmp.eq.s32.totalorder %s834_s14, 0  ;;  %p85_p3 = scmp.ne.s32.totalorder %s818_s10, %s814_s9 }
   0xa   : > { %s988_s17 = smov (%p39_p0, %s37_s17), 0  ;;  %p86_p5 = scmp.eq.s32.totalorder %s642_s15, 0 }
   0xb   : > { %p892_p4 = por %p80_p2, %p79_p1  ;;  %s67_s20 = ssub.s32 %s830_s13, %s988_s17 }
   0xc   : > { %p113_p6 = scmp.eq.s32.totalorder %s642_s15, 1  ;;  %p70_p7 = scmp.eq.s32.totalorder %s67_s20, 0 }
   0xd   : > { %p898_p8 = por %p86_p5, %p85_p3  ;;  %p119_p10 = scmp.eq.s32.totalorder %s643_s16, 1 }
   0xe   : > { %p902_p9 = por %p113_p6, %p79_p1  ;;  %p646_p12 = scmp.ge.s32.totalorder %s834_s14, 2 }
   0xf   : > { %s907_s23 = scalar_select %p70_p7, %s822_s11, %s72_s18  }
  0x10   : > { %p909_p11 = por %p119_p10, %p85_p3  ;;  %p672_p13 = scmp.lt.s32.totalorder %s834_s14, 2 }
  0x11   : > { %s146_s25 = sand.u32 1, %s822_s11   ;;  %s658_s27 = sshll.u32 %s830_s13, 3 }
  0x12   : > { %s647_s26 = sshll.u32 %s146_s25, 3  ;;  %s157_s30 = scalar_lea.hbm %s976_s1, %s658_s27 }
  0x13   : > { %s150_s3 = scalar_lea.vmem [#allocation2], %s647_s26  ;;  %s159_s5 = sshll.u32 %s157_s30, 4  ;;  %s160_s5 = int_to_ptr.hbm [resolvable:$true] %s159_s5 }
  0x14   : > { %s161_s4 = sshll.u32 %s150_s3, 4  ;;  %p665_p0 = pnand %p672_p13, %p892_p4  ;;  %s162_s4 = int_to_ptr.vmem [resolvable:$true] %s161_s4 }
  0x15   : > { %p650_p1 = scmp.ge.s32.totalorder %s834_s14, 1  ;;  %p166_p2 = scmp.lt.s32.totalorder %s834_s14, 3 }
  0x16   : > { %s147_s6 = scalar_lea.sflag [#allocation3], %s146_s25 }
  0x17   : > { %667 = dma.hbm_to_vmem [thread:$0]  (!%p665_p0), %s160_s5, 128, %s162_s4, %s147_s6  }
  0x18   : > { %p167_p3 = pnand %p650_p1, %p166_p2 }
  0x19   : > { %s925_s7 = sand.u32 (!%p167_p3), 1, %s818_s10  }
  0x1a   : > { %170 = sbr.rel (%p167_p3) target bundleno = 204 (0xcc), region = 28  ;;  %s651_s8 = sshll.u32 (!%p167_p3), %s925_s7, 3 }
  0x1b   : > { %s173_s15 = scalar_lea.sflag (!%p167_p3), [#allocation3], %s925_s7  ;;  %s176_s16 = scalar_lea.vmem (!%p167_p3), [#allocation2], %s651_s8 }
  0x1f   : > { %805 = dma.done.wait (%p898_p8), %s173_s15, 128  }
  0x20   : > { %807 = vsyncadd (%p898_p8), %s173_s15, 4294967168  ;;  %vm214_vm0 = vcmask 31744   ;;  %v209_v0 = vld [vmem:[%s176_s16] sm:$0xff]  ;;  %v208_v1 = vld [vmem:[%s975_s0] sm:$0xff]  ;;  %vm218_vm1 = vcmask 1043456   ;;  %s652_s20 = sshll.u32 %s925_s7, 4 }
  0x21   : > { %211 = vst [vmem:[#allocation1] ss:$2 sm:$0xff] %v209_v0  ;;  %v216_v2 = vsel %vm214_vm0, %v208_v1, 0  ;;  %s201_s21 = scalar_lea.vmem [#allocation5], %s652_s20  ;;  %s659_s25 = sshll.u32 %s826_s12, 4 }
  0x22   : > { %v240_v3 = vand.u32 4294901760, %v216_v2  ;;  %s533_s28 = scalar_lea.hbm %s977_s2, %s659_s25  ;;  %s535_s29 = sshll.u32 %s201_s21, 4  ;;  %s536_s29 = int_to_ptr.vmem [resolvable:$true] %s535_s29 }
  0x23   : > { %s537_s30 = sshll.u32 %s533_s28, 4  ;;  %s518_s3 = scalar_lea.sflag [#allocation4], %s925_s7  ;;  %s538_s30 = int_to_ptr.hbm [resolvable:$true] %s537_s30 }
  0x24   : > { %v241_v4 = vsub.f32 %v216_v2, %v240_v3  ;;  %s766_s4 = sshra.s32 %s538_s30, 4  ;;  %s772_s8 = scalar_lea.hbm %s977_s2, 32  ;;  %s767_s4 = int_to_ptr.hbm [resolvable:$true] %s766_s4 }
  0x25   : > { %s768_s12 = scalar_lea.hbm %s767_s4, 16  ;;  %p773_p7 = scmp.lt.s32.totalorder %s767_s4, %s977_s2 }
  0x26   : > { %v242_v5 = vand.u32 4294901760, %v241_v4  ;;  %p769_p4 = scmp.ne.s32.totalorder %s767_s4, %s768_s12  ;;  %p774_p8 = scmp.lt.s32.totalorder %s772_s8, %s768_s12 }
  0x28   : > { %v212_v6 = vld.sshfl [vmem:[#allocation1] sm:$0xff pattern:$0x75316420]  ;;  %v213_v7 = vld.sshfl [vmem:[#allocation1 + $0x8] sm:$0xff pattern:$0x75316420]  ;;  %v243_v8 = vsub.f32 %v241_v4, %v242_v5  ;;  %p770_p5 = pnand %p769_p4, %p902_p9  ;;  %p775_p10 = por %p774_p8, %p773_p7 }
  0x29   : > { %v219_v9 = vsel %vm218_vm1, %v212_v6, 0  ;;  %v221_v10 = vsel %vm218_vm1, %v213_v7, 0 }
  0x2a   : > { %v238_v11 = vand.u32 4294901760, %v219_v9  ;;  %v244_v12 = vand.u32 4294901760, %v243_v8  ;;  %v384_v13 = vand.u32 4294901760, %v221_v10  ;;  %p771_p6 = pneg %p770_p5 }
  0x2c   : > { %v265_v14 = vsub.f32 %v219_v9, %v238_v11  ;;  %239 = vmatpush.msra.mxu0 %v238_v11  ;;  %315 = vmatpush.msra.mxu3 %v238_v11  ;;  %v411_v15 = vsub.f32 %v221_v10, %v384_v13  ;;  %p776_p13 = pnand %p775_p10, %p771_p6 }
  0x2d   : > { %245 = vmatmul.f32.vlgmr.msra.gmra.mxu0 %v244_v12  ;;  %319 = vmatmul.f32.vlgmr.msra.gmra.mxu3 %v242_v5 }
  0x2e   : > { %292 = vmatpush.msra.mxu2 %v265_v14  ;;  %v266_v16 = vand.u32 4294901760, %v265_v14  ;;  %v412_v17 = vand.u32 4294901760, %v411_v15 }
  0x2f   : > { %295 = vmatmul.f32.vlgmr.msra.gmra.mxu2 %v241_v4 }
  0x30   : > { %385 = vmatpush.msrb.mxu2 %v384_v13  ;;  %v267_v18 = vsub.f32 %v265_v14, %v266_v16  ;;  %341 = vmatpush.msrb.mxu0 %v266_v16  ;;  %v413_v19 = vsub.f32 %v411_v15, %v412_v17 }
  0x32   : > { %487 = vmatpush.msra.mxu2 %v412_v17  ;;  %438 = vmatpush.msra.mxu0 %v411_v15  ;;  %v268_v20 = vand.u32 4294901760, %v267_v18  ;;  %v414_v21 = vand.u32 4294901760, %v413_v19 }
  0x34   : > { %269 = vmatpush.msra.mxu1 %v268_v20  ;;  %415 = vmatpush.msrb.mxu3 %v414_v21 }
  0x35   : > { %271 = vmatmul.f32.vlgmr.msra.gmra.mxu1 %v240_v3  ;;  %343 = vmatmul.f32.vlgmr.msrb.gmra.mxu0 %v240_v3 }
  0x36   : > { %363 = vmatpush.msrb.mxu1 %v238_v11  ;;  %417 = vmatmul.f32.vlgmr.msrb.gmra.mxu3 %v240_v3 }
  0x37   : > { %391 = vmatmul.f32.vlgmr.msrb.gmra.mxu2 %v244_v12  ;;  %509 = vmatpush.msra.mxu3 %v384_v13 }
  0x38   : > { %461 = vmatpush.msra.mxu1 %v384_v13 }
  0x3d   : > { %365 = vmatmul.f32.vlgmr.msrb.gmra.mxu1 %v240_v3  ;;  %441 = vmatmul.f32.vlgmr.msra.gmra.mxu0 %v241_v4 }
  0x3e   : > { %511 = vmatmul.f32.vlgmr.msra.gmra.mxu3 %v240_v3 }
  0x3f   : > { %489 = vmatmul.f32.vlgmr.msra.gmra.mxu2 %v240_v3 }
  0x45   : > { %465 = vmatmul.f32.vlgmr.msra.gmra.mxu1 %v242_v5 }
  0xaa   : > { %v246_v22 = vpop.f32.mrf.mxu0 }
  0xb0   : > { %v320_v23 = vpop.f32.mrf.mxu3 }
  0xb2   : > { %v272_v24 = vpop.f32.mrf.mxu1  ;;  %v296_v25 = vpop.f32.mrf.mxu2 }
  0xb3   : > { %v273_v26 = vadd.f32 %v272_v24, %v246_v22  ;;  %v344_v27 = vpop.f32.mrf.mxu0 }
  0xb5   : > { %v297_v28 = vadd.f32 %v296_v25, %v273_v26 }
  0xb7   : > { %v321_v29 = vadd.f32 %v320_v23, %v297_v28 }
  0xb9   : > { %v345_v30 = vadd.f32 %v344_v27, %v321_v29  ;;  %v418_v31 = vpop.f32.mrf.mxu3 }
  0xba   : > { %v366_v32 = vpop.f32.mrf.mxu1  ;;  %v392_v33 = vpop.f32.mrf.mxu2 }
  0xbb   : > { %v367_v34 = vadd.f32 %v366_v32, %v345_v30  ;;  %v419_v35 = vadd.f32 %v418_v31, %v392_v33  ;;  %v442_v36 = vpop.f32.mrf.mxu0 }
  0xbd   : > { %515 = vst [vmem:[%s201_s21] sm:$0xff] %v367_v34  ;;  %v443_v37 = vadd.f32 %v442_v36, %v419_v35 }
  0xc1   : > { %v512_v41 = vpop.f32.mrf.mxu3 }
  0xc2   : > { %v466_v38 = vpop.f32.mrf.mxu1  ;;  %v490_v39 = vpop.f32.mrf.mxu2 }
  0xc3   : > { %v467_v40 = vadd.f32 %v466_v38, %v443_v37 }
  0xc5   : > { %v491_v42 = vadd.f32 %v490_v39, %v467_v40 }
  0xc7   : > { %v513_v43 = vadd.f32 %v512_v41, %v491_v42 }
  0xc9   : > { %516 = vst [vmem:[%s201_s21 + $0x8] sm:$0xff] %v513_v43 }
  0xca   : > { %779 = shalt.err (!%p776_p13)
}
  0xcb   : > { %662 = dma.vmem_to_hbm [thread:$0]  (%p902_p9), %s536_s29, 256, %s538_s30, %s518_s3  }
  0xcc PF: > { %s549_s7 = sand.u32 1, %s814_s9   ;;  %p669_p0 = pnand %p646_p12, %p909_p11 }
  0xcd   : > { %s550_s18 = scalar_lea.sflag [#allocation4], %s549_s7 }
  0xce   : > { %p670_p1 = pneg %p669_p0 }
  0xd0   : > { %809 = dma.done.wait (%p670_p1), %s550_s18, 256  }
  0xd1   : > { %811 = vsyncadd (%p670_p1), %s550_s18, 4294967040  ;;  %s18_s14 = sadd.s32 1, %s834_s14   ;;  %s982_s9 = smov %s818_s10 }
  0xd2   : > { %p15_p2 = scmp.ge.s32.totalorder %s18_s14, 4   ;;  %s983_s10 = smov %s822_s11 }
  0xd3   : > { %s984_s11 = smov %s907_s23  ;;  %s985_s12 = smov %s830_s13 }
  0xd4   : > { %s986_s13 = smov %s988_s17  ;;  %17 = sbr.rel (!%p15_p2) target bundleno = 6 (0x6), region = 76 }
  0xd9   :  { %556 = vsyncpa [#allocation3], 1 }
  0xda   :  { %558 = vsyncpa [#allocation3 + $0x1], 1 }
  0xdb   :  { %559 = vsyncpa [#allocation4], 1 }
  0xdc   :  { %561 = vsyncpa [#allocation4 + $0x1], 1 }

// kernel: tpu_custom_call.1
= control target key start
LH: loop header
LB: loop body
LE: loop exit
PB: predicated region body
PF: predicated region fallthrough
CT: control target
= control target key end

     0   :  { %7 = vsyncpa [#allocation3], 0  ;;  %s975_s0 = inlined_call_operand.vmem [shape: f32[8,4], index: 0, kind: input, shape index: {}]   ;;  %s976_s1 = inlined_call_operand.hbm [shape: f32[2,4,256], index: 1, kind: input, shape index: {}]   ;;  %s977_s2 = inlined_call_operand.hbm [shape: f32[2,8,256], index: 2, kind: output, shape index: {}]  }
   0x1   :  { %9 = vsyncpa [#allocation3 + $0x1], 0 }
   0x2   :  { %10 = vsyncpa [#allocation4], 0 }
   0x3   :  { %12 = vsyncpa [#allocation4 + $0x1], 0  ;;  %s851_s9 = smov 0   ;;  %s853_s10 = smov 0  }
   0x4   :  { %s855_s11 = smov 0   ;;  %s857_s12 = smov 0  }
   0x5   :  { %s859_s13 = smov 0   ;;  %s861_s14 = smov 0  }
   0x6 LB: > { %s642_s15 = sadd.s32 4294967295, %s834_s14   ;;  %s643_s16 = sadd.s32 4294967294, %s834_s14   ;;  %s834_s14 = sphi %s861_s14, %s18_s14   ;;  %s830_s13 = sphi %s859_s13, %s986_s13   ;;  %s826_s12 = sphi %s857_s12, %s985_s12   ;;  %s822_s11 = sphi %s855_s11, %s984_s11   ;;  %s818_s10 = sphi %s853_s10, %s983_s10   ;;  %s814_s9 = sphi %s851_s9, %s982_s9  }
   0x7   : > { %s37_s17 = sadd.s32 1, %s830_s13  ;;  %s72_s18 = sadd.s32 1, %s822_s11 }
   0x8   : > { %p39_p0 = scmp.ge.s32.totalorder %s37_s17, 2  ;;  %p79_p1 = scmp.ne.s32.totalorder %s822_s11, %s818_s10 }
   0x9   : > { %p80_p2 = scmp.eq.s32.totalorder %s834_s14, 0  ;;  %p85_p3 = scmp.ne.s32.totalorder %s818_s10, %s814_s9 }
   0xa   : > { %s988_s17 = smov (%p39_p0, %s37_s17), 0  ;;  %p86_p5 = scmp.eq.s32.totalorder %s642_s15, 0 }
   0xb   : > { %p892_p4 = por %p80_p2, %p79_p1  ;;  %s67_s20 = ssub.s32 %s830_s13, %s988_s17 }
   0xc   : > { %p113_p6 = scmp.eq.s32.totalorder %s642_s15, 1  ;;  %p70_p7 = scmp.eq.s32.totalorder %s67_s20, 0 }
   0xd   : > { %p898_p8 = por %p86_p5, %p85_p3  ;;  %p119_p10 = scmp.eq.s32.totalorder %s643_s16, 1 }
   0xe   : > { %p902_p9 = por %p113_p6, %p79_p1  ;;  %p646_p12 = scmp.ge.s32.totalorder %s834_s14, 2 }
   0xf   : > { %s907_s23 = scalar_select %p70_p7, %s822_s11, %s72_s18  }
  0x10   : > { %p909_p11 = por %p119_p10, %p85_p3  ;;  %p672_p13 = scmp.lt.s32.totalorder %s834_s14, 2 }
  0x11   : > { %s146_s25 = sand.u32 1, %s822_s11   ;;  %s658_s27 = sshll.u32 %s830_s13, 3 }
  0x12   : > { %s647_s26 = sshll.u32 %s146_s25, 3  ;;  %s157_s30 = scalar_lea.hbm %s976_s1, %s658_s27 }
  0x13   : > { %s150_s3 = scalar_lea.vmem [#allocation2], %s647_s26  ;;  %s159_s5 = sshll.u32 %s157_s30, 4  ;;  %s160_s5 = int_to_ptr.hbm [resolvable:$true] %s159_s5 }
  0x14   : > { %s161_s4 = sshll.u32 %s150_s3, 4  ;;  %p665_p0 = pnand %p672_p13, %p892_p4  ;;  %s162_s4 = int_to_ptr.vmem [resolvable:$true] %s161_s4 }
  0x15   : > { %p650_p1 = scmp.ge.s32.totalorder %s834_s14, 1  ;;  %p166_p2 = scmp.lt.s32.totalorder %s834_s14, 3 }
  0x16   : > { %s147_s6 = scalar_lea.sflag [#allocation3], %s146_s25 }
  0x17   : > { %667 = dma.hbm_to_vmem [thread:$0]  (!%p665_p0), %s160_s5, 128, %s162_s4, %s147_s6  }
  0x18   : > { %p167_p3 = pnand %p650_p1, %p166_p2 }
  0x19   : > { %s925_s7 = sand.u32 (!%p167_p3), 1, %s818_s10  }
  0x1a   : > { %170 = sbr.rel (%p167_p3) target bundleno = 204 (0xcc), region = 28  ;;  %s651_s8 = sshll.u32 (!%p167_p3), %s925_s7, 3 }
  0x1b   : > { %s173_s15 = scalar_lea.sflag (!%p167_p3), [#allocation3], %s925_s7  ;;  %s176_s16 = scalar_lea.vmem (!%p167_p3), [#allocation2], %s651_s8 }
  0x1f   : > { %805 = dma.done.wait (%p898_p8), %s173_s15, 128  }
  0x20   : > { %807 = vsyncadd (%p898_p8), %s173_s15, 4294967168  ;;  %vm214_vm0 = vcmask 31744   ;;  %v209_v0 = vld [vmem:[%s176_s16] sm:$0xff]  ;;  %v208_v1 = vld [vmem:[%s975_s0] sm:$0xff]  ;;  %vm218_vm1 = vcmask 1043456   ;;  %s652_s20 = sshll.u32 %s925_s7, 4 }
  0x21   : > { %211 = vst [vmem:[#allocation1] ss:$2 sm:$0xff] %v209_v0  ;;  %v216_v2 = vsel %vm214_vm0, %v208_v1, 0  ;;  %s201_s21 = scalar_lea.vmem [#allocation5], %s652_s20  ;;  %s659_s25 = sshll.u32 %s826_s12, 4 }
  0x22   : > { %v240_v3 = vand.u32 4294901760, %v216_v2  ;;  %s533_s28 = scalar_lea.hbm %s977_s2, %s659_s25  ;;  %s535_s29 = sshll.u32 %s201_s21, 4  ;;  %s536_s29 = int_to_ptr.vmem [resolvable:$true] %s535_s29 }
  0x23   : > { %s537_s30 = sshll.u32 %s533_s28, 4  ;;  %s518_s3 = scalar_lea.sflag [#allocation4], %s925_s7  ;;  %s538_s30 = int_to_ptr.hbm [resolvable:$true] %s537_s30 }
  0x24   : > { %v241_v4 = vsub.f32 %v216_v2, %v240_v3  ;;  %s766_s4 = sshra.s32 %s538_s30, 4  ;;  %s772_s8 = scalar_lea.hbm %s977_s2, 32  ;;  %s767_s4 = int_to_ptr.hbm [resolvable:$true] %s766_s4 }
  0x25   : > { %s768_s12 = scalar_lea.hbm %s767_s4, 16  ;;  %p773_p7 = scmp.lt.s32.totalorder %s767_s4, %s977_s2 }
  0x26   : > { %v242_v5 = vand.u32 4294901760, %v241_v4  ;;  %p769_p4 = scmp.ne.s32.totalorder %s767_s4, %s768_s12  ;;  %p774_p8 = scmp.lt.s32.totalorder %s772_s8, %s768_s12 }
  0x28   : > { %v212_v6 = vld.sshfl [vmem:[#allocation1] sm:$0xff pattern:$0x75316420]  ;;  %v213_v7 = vld.sshfl [vmem:[#allocation1 + $0x8] sm:$0xff pattern:$0x75316420]  ;;  %v243_v8 = vsub.f32 %v241_v4, %v242_v5  ;;  %p770_p5 = pnand %p769_p4, %p902_p9  ;;  %p775_p10 = por %p774_p8, %p773_p7 }
  0x29   : > { %v219_v9 = vsel %vm218_vm1, %v212_v6, 0  ;;  %v221_v10 = vsel %vm218_vm1, %v213_v7, 0 }
  0x2a   : > { %v238_v11 = vand.u32 4294901760, %v219_v9  ;;  %v244_v12 = vand.u32 4294901760, %v243_v8  ;;  %v384_v13 = vand.u32 4294901760, %v221_v10  ;;  %p771_p6 = pneg %p770_p5 }
  0x2c   : > { %v265_v14 = vsub.f32 %v219_v9, %v238_v11  ;;  %239 = vmatpush.msra.mxu0 %v238_v11  ;;  %315 = vmatpush.msra.mxu3 %v238_v11  ;;  %v411_v15 = vsub.f32 %v221_v10, %v384_v13  ;;  %p776_p13 = pnand %p775_p10, %p771_p6 }
  0x2d   : > { %245 = vmatmul.f32.vlgmr.msra.gmra.mxu0 %v244_v12  ;;  %319 = vmatmul.f32.vlgmr.msra.gmra.mxu3 %v242_v5 }
  0x2e   : > { %292 = vmatpush.msra.mxu2 %v265_v14  ;;  %v266_v16 = vand.u32 4294901760, %v265_v14  ;;  %v412_v17 = vand.u32 4294901760, %v411_v15 }
  0x2f   : > { %295 = vmatmul.f32.vlgmr.msra.gmra.mxu2 %v241_v4 }
  0x30   : > { %385 = vmatpush.msrb.mxu2 %v384_v13  ;;  %v267_v18 = vsub.f32 %v265_v14, %v266_v16  ;;  %341 = vmatpush.msrb.mxu0 %v266_v16  ;;  %v413_v19 = vsub.f32 %v411_v15, %v412_v17 }
  0x32   : > { %487 = vmatpush.msra.mxu2 %v412_v17  ;;  %438 = vmatpush.msra.mxu0 %v411_v15  ;;  %v268_v20 = vand.u32 4294901760, %v267_v18  ;;  %v414_v21 = vand.u32 4294901760, %v413_v19 }
  0x34   : > { %269 = vmatpush.msra.mxu1 %v268_v20  ;;  %415 = vmatpush.msrb.mxu3 %v414_v21 }
  0x35   : > { %271 = vmatmul.f32.vlgmr.msra.gmra.mxu1 %v240_v3  ;;  %343 = vmatmul.f32.vlgmr.msrb.gmra.mxu0 %v240_v3 }
  0x36   : > { %363 = vmatpush.msrb.mxu1 %v238_v11  ;;  %417 = vmatmul.f32.vlgmr.msrb.gmra.mxu3 %v240_v3 }
  0x37   : > { %391 = vmatmul.f32.vlgmr.msrb.gmra.mxu2 %v244_v12  ;;  %509 = vmatpush.msra.mxu3 %v384_v13 }
  0x38   : > { %461 = vmatpush.msra.mxu1 %v384_v13 }
  0x3d   : > { %365 = vmatmul.f32.vlgmr.msrb.gmra.mxu1 %v240_v3  ;;  %441 = vmatmul.f32.vlgmr.msra.gmra.mxu0 %v241_v4 }
  0x3e   : > { %511 = vmatmul.f32.vlgmr.msra.gmra.mxu3 %v240_v3 }
  0x3f   : > { %489 = vmatmul.f32.vlgmr.msra.gmra.mxu2 %v240_v3 }
  0x45   : > { %465 = vmatmul.f32.vlgmr.msra.gmra.mxu1 %v242_v5 }
  0xaa   : > { %v246_v22 = vpop.f32.mrf.mxu0 }
  0xb0   : > { %v320_v23 = vpop.f32.mrf.mxu3 }
  0xb2   : > { %v272_v24 = vpop.f32.mrf.mxu1  ;;  %v296_v25 = vpop.f32.mrf.mxu2 }
  0xb3   : > { %v273_v26 = vadd.f32 %v272_v24, %v246_v22  ;;  %v344_v27 = vpop.f32.mrf.mxu0 }
  0xb5   : > { %v297_v28 = vadd.f32 %v296_v25, %v273_v26 }
  0xb7   : > { %v321_v29 = vadd.f32 %v320_v23, %v297_v28 }
  0xb9   : > { %v345_v30 = vadd.f32 %v344_v27, %v321_v29  ;;  %v418_v31 = vpop.f32.mrf.mxu3 }
  0xba   : > { %v366_v32 = vpop.f32.mrf.mxu1  ;;  %v392_v33 = vpop.f32.mrf.mxu2 }
  0xbb   : > { %v367_v34 = vadd.f32 %v366_v32, %v345_v30  ;;  %v419_v35 = vadd.f32 %v418_v31, %v392_v33  ;;  %v442_v36 = vpop.f32.mrf.mxu0 }
  0xbd   : > { %515 = vst [vmem:[%s201_s21] sm:$0xff] %v367_v34  ;;  %v443_v37 = vadd.f32 %v442_v36, %v419_v35 }
  0xc1   : > { %v512_v41 = vpop.f32.mrf.mxu3 }
  0xc2   : > { %v466_v38 = vpop.f32.mrf.mxu1  ;;  %v490_v39 = vpop.f32.mrf.mxu2 }
  0xc3   : > { %v467_v40 = vadd.f32 %v466_v38, %v443_v37 }
  0xc5   : > { %v491_v42 = vadd.f32 %v490_v39, %v467_v40 }
  0xc7   : > { %v513_v43 = vadd.f32 %v512_v41, %v491_v42 }
  0xc9   : > { %516 = vst [vmem:[%s201_s21 + $0x8] sm:$0xff] %v513_v43 }
  0xca   : > { %779 = shalt.err (!%p776_p13)
}
  0xcb   : > { %662 = dma.vmem_to_hbm [thread:$0]  (%p902_p9), %s536_s29, 256, %s538_s30, %s518_s3  }
  0xcc PF: > { %s549_s7 = sand.u32 1, %s814_s9   ;;  %p669_p0 = pnand %p646_p12, %p909_p11 }
  0xcd   : > { %s550_s18 = scalar_lea.sflag [#allocation4], %s549_s7 }
  0xce   : > { %p670_p1 = pneg %p669_p0 }
  0xd0   : > { %809 = dma.done.wait (%p670_p1), %s550_s18, 256  }
  0xd1   : > { %811 = vsyncadd (%p670_p1), %s550_s18, 4294967040  ;;  %s18_s14 = sadd.s32 1, %s834_s14   ;;  %s982_s9 = smov %s818_s10 }
  0xd2   : > { %p15_p2 = scmp.ge.s32.totalorder %s18_s14, 4   ;;  %s983_s10 = smov %s822_s11 }
  0xd3   : > { %s984_s11 = smov %s907_s23  ;;  %s985_s12 = smov %s830_s13 }
  0xd4   : > { %s986_s13 = smov %s988_s17  ;;  %17 = sbr.rel (!%p15_p2) target bundleno = 6 (0x6), region = 76 }
  0xd9   :  { %556 = vsyncpa [#allocation3], 1 }
  0xda   :  { %558 = vsyncpa [#allocation3 + $0x1], 1 }
  0xdb   :  { %559 = vsyncpa [#allocation4], 1 }
  0xdc   :  { %561 = vsyncpa [#allocation4 + $0x1], 1 }

</bundles_post_ra>
